<compile_context>
chip_gen: v7x
topology: tpu7x:2x2x1
jax: 0.10.0
libtpu: 0.0.40
codegen_flags: <defaults>
</compile_context>

<pallas_src>
import jax
import jax.numpy as jnp
import numpy as np
from jax.experimental import pallas as pl
from jax.experimental.pallas import tpu as pltpu

LANE = 128          # lane width: feature dims padded to multiples of this
SUB = 8             # sublane width: row dims padded to multiples of this
NEG_SLOPE = 0.01    # F.leaky_relu default negative slope


def _rup(n, m):
    return ((n + m - 1) // m) * m


def _pad_to(a, rows, cols):
    a = jnp.asarray(a, jnp.float32)
    out = jnp.zeros((rows, cols), jnp.float32)
    return out.at[: a.shape[0], : a.shape[1]].set(a)


# ----------------------------- Pallas kernel ------------------------------ #
def point_encoder_kernel(x_ref, w_ref, b_ref, out_ref):
    """x_ref: (tb, D) f32; w_ref: (L, D, D) f32/bf16; b_ref: (L, 1, D) f32."""
    n_layers = w_ref.shape[0]
    h = x_ref[...]                                   # f32 activations
    for i in range(n_layers):                        # static unroll (L=5)
        z = jnp.dot(h.astype(w_ref.dtype), w_ref[i],
                    preferred_element_type=jnp.float32) + b_ref[i]
        if i < n_layers - 1:
            h = jnp.maximum(z, NEG_SLOPE * z)        # leaky_relu (mul+max)
        else:
            h = jnp.tanh(z)                          # final tanh (EUP, f32)
    out_ref[...] = h


# ------------------------------- JAX glue ---------------------------------- #
def make_params(key, input_size, hidden_size):
    """torch.nn.Linear-style init; weights stored (out, in)."""
    dims = [input_size, input_size, int(input_size // 1.2),
            int(input_size // 1.5), int(input_size // 1.7), hidden_size]
    keys = jax.random.split(key, len(dims) - 1)
    params = []
    for i in range(len(dims) - 1):
        kw, kb = jax.random.split(keys[i])
        bound = 1.0 / np.sqrt(dims[i])
        W = jax.random.uniform(kw, (dims[i + 1], dims[i]), jnp.float32,
                               -bound, bound)
        b = jax.random.uniform(kb, (dims[i + 1],), jnp.float32, -bound, bound)
        params.append((W, b))
    return params


def point_encoder_pallas(x, params, *, use_bf16=False, tile_b=256):
    """Fused PointEncoder forward. x: (B, input_size) f32."""
    L = len(params)
    # One square pad size D covers every layer's in/out dim so the activation
    # can flow through the stacked (D, D) weights without re-slicing.
    dims = [params[0][0].shape[1]] + [W.shape[0] for W, _ in params]
    D = max(_rup(d, LANE) for d in dims)

    # Pack weights (transposed to (in, out)) and biases into two slabs.
    w_slab = jnp.stack([_pad_to(W.T, D, D) for W, _ in params])          # (L,D,D)
    b_slab = jnp.stack([_pad_to(b[None, :], 1, D) for _, b in params])   # (L,1,D)
    if use_bf16:
        # bf16 operands into the MXU; accumulation stays f32 in the kernel.
        w_slab = w_slab.astype(jnp.bfloat16)

    B = x.shape[0]
    tb = min(_rup(tile_b, SUB), _rup(B, SUB))        # batch tile (rows)
    Bp = _rup(B, tb)
    x_p = _pad_to(x, Bp, D)

    grid = (Bp // tb,)
    out_padded = pl.pallas_call(
        point_encoder_kernel,
        out_shape=jax.ShapeDtypeStruct((Bp, D), jnp.float32),
        grid=grid,
        in_specs=[
            pl.BlockSpec((tb, D), lambda i: (i, 0)),        # activation tile
            pl.BlockSpec((L, D, D), lambda i: (0, 0, 0)),   # weight slab
            pl.BlockSpec((L, 1, D), lambda i: (0, 0, 0)),   # bias slab
        ],
        out_specs=pl.BlockSpec((tb, D), lambda i: (i, 0)),
        compiler_params=pltpu.CompilerParams(
            dimension_semantics=("parallel",)),             # megacore on v7x
    )(x_p, w_slab, b_slab)

    out_dim = params[-1][0].shape[0]
    return out_padded[:B, :out_dim]


def point_encoder_ref(x, params):
    """Pure-JAX reference matching the PyTorch forward semantics."""
    h = x
    for i, (W, b) in enumerate(params):
        h = h @ W.T + b
        if i < len(params) - 1:
            h = jnp.where(h > 0, h, NEG_SLOPE * h)
        else:
            h = jnp.tanh(h)
    return h


if __name__ == "__main__":
    # Small, module-consistent shapes (scaled-down hidden/input sizes).
    hidden_size = 32
    input_size = 64
    batch = 8

    key = jax.random.PRNGKey(0)
    kparam, kx = jax.random.split(key)
    params = make_params(kparam, input_size, hidden_size)
    x = jax.random.normal(kx, (batch, input_size), jnp.float32)

    ref = point_encoder_ref(x, params)

    # f32 path: tight tolerance.
    out_f32 = jax.block_until_ready(
        point_encoder_pallas(x, params, use_bf16=False))
    np.testing.assert_allclose(np.asarray(out_f32), np.asarray(ref),
                               rtol=1e-4, atol=1e-4)

    # bf16-to-MXU path (v6e/v7x optimization): looser tolerance.
    out_bf16 = jax.block_until_ready(
        point_encoder_pallas(x, params, use_bf16=True))
    np.testing.assert_allclose(np.asarray(out_bf16), np.asarray(ref),
                               rtol=5e-2, atol=5e-2)

    print("KERNEL_OK")
</pallas_src>

<mosaic_0001>
module attributes {stable_mosaic.version = 11 : i64} {
  func.func @point_encoder_kernel(%arg0: i32, %arg1: memref<8x128xf32, #tpu.memory_space<vmem>>, %arg2: memref<5x128x128xf32, #tpu.memory_space<vmem>>, %arg3: memref<5x1x128xf32, #tpu.memory_space<vmem>>, %arg4: memref<8x128xf32, #tpu.memory_space<vmem>>) attributes {dimension_semantics = [#tpu.dimension_semantics<parallel>], iteration_bounds = array<i64: 1>, scalar_prefetch = 0 : i64, scratch_operands = 0 : i64, tpu.core_type = #tpu.core_type<tc>, window_params = [{transform_indices = @transform_0, window_bounds = array<i64: 8, 128>}, {pipeline_mode = #tpu.pipeline_mode<synchronous>, transform_indices = @transform_1, window_bounds = array<i64: 5, 128, 128>}, {pipeline_mode = #tpu.pipeline_mode<synchronous>, transform_indices = @transform_2, window_bounds = array<i64: 5, 1, 128>}, {transform_indices = @transform_3, window_bounds = array<i64: 8, 128>}]} {
    %c0 = arith.constant 0 : index
    %c0_0 = arith.constant 0 : index
    %0 = vector.load %arg1[%c0, %c0_0] : memref<8x128xf32, #tpu.memory_space<vmem>>, vector<8x128xf32>
    %c0_1 = arith.constant 0 : index
    %c0_2 = arith.constant 0 : index
    %c0_3 = arith.constant 0 : index
    %1 = vector.load %arg2[%c0_1, %c0_2, %c0_3] : memref<5x128x128xf32, #tpu.memory_space<vmem>>, vector<1x128x128xf32>
    %2 = vector.shape_cast %1 : vector<1x128x128xf32> to vector<128x128xf32>
    %cst = arith.constant dense<0.000000e+00> : vector<8x128xf32>
    %3 = tpu.matmul %0, %2, %cst {dimension_numbers = #tpu.dot_dimension_numbers<[1], [0], [0], [1], [0, 0, 1, 1], [], []>} : vector<8x128xf32>, vector<128x128xf32>, vector<8x128xf32> -> vector<8x128xf32>
    %c0_4 = arith.constant 0 : index
    %c0_5 = arith.constant 0 : index
    %c0_6 = arith.constant 0 : index
    %4 = vector.load %arg3[%c0_4, %c0_5, %c0_6] : memref<5x1x128xf32, #tpu.memory_space<vmem>>, vector<1x1x128xf32>
    %5 = vector.shape_cast %4 : vector<1x1x128xf32> to vector<1x128xf32>
    %6 = vector.broadcast %5 : vector<1x128xf32> to vector<8x128xf32>
    %7 = arith.addf %3, %6 : vector<8x128xf32>
    %cst_7 = arith.constant 0.00999999977 : f32
    %8 = vector.broadcast %cst_7 : f32 to vector<8x128xf32>
    %9 = arith.mulf %8, %7 : vector<8x128xf32>
    %10 = arith.maximumf %7, %9 : vector<8x128xf32>
    %c1 = arith.constant 1 : index
    %c0_8 = arith.constant 0 : index
    %c0_9 = arith.constant 0 : index
    %11 = vector.load %arg2[%c1, %c0_8, %c0_9] : memref<5x128x128xf32, #tpu.memory_space<vmem>>, vector<1x128x128xf32>
    %12 = vector.shape_cast %11 : vector<1x128x128xf32> to vector<128x128xf32>
    %cst_10 = arith.constant dense<0.000000e+00> : vector<8x128xf32>
    %13 = tpu.matmul %10, %12, %cst_10 {dimension_numbers = #tpu.dot_dimension_numbers<[1], [0], [0], [1], [0, 0, 1, 1], [], []>} : vector<8x128xf32>, vector<128x128xf32>, vector<8x128xf32> -> vector<8x128xf32>
    %c1_11 = arith.constant 1 : index
    %c0_12 = arith.constant 0 : index
    %c0_13 = arith.constant 0 : index
    %14 = vector.load %arg3[%c1_11, %c0_12, %c0_13] : memref<5x1x128xf32, #tpu.memory_space<vmem>>, vector<1x1x128xf32>
    %15 = vector.shape_cast %14 : vector<1x1x128xf32> to vector<1x128xf32>
    %16 = vector.broadcast %15 : vector<1x128xf32> to vector<8x128xf32>
    %17 = arith.addf %13, %16 : vector<8x128xf32>
    %cst_14 = arith.constant 0.00999999977 : f32
    %18 = vector.broadcast %cst_14 : f32 to vector<8x128xf32>
    %19 = arith.mulf %18, %17 : vector<8x128xf32>
    %20 = arith.maximumf %17, %19 : vector<8x128xf32>
    %c2 = arith.constant 2 : index
    %c0_15 = arith.constant 0 : index
    %c0_16 = arith.constant 0 : index
    %21 = vector.load %arg2[%c2, %c0_15, %c0_16] : memref<5x128x128xf32, #tpu.memory_space<vmem>>, vector<1x128x128xf32>
    %22 = vector.shape_cast %21 : vector<1x128x128xf32> to vector<128x128xf32>
    %cst_17 = arith.constant dense<0.000000e+00> : vector<8x128xf32>
    %23 = tpu.matmul %20, %22, %cst_17 {dimension_numbers = #tpu.dot_dimension_numbers<[1], [0], [0], [1], [0, 0, 1, 1], [], []>} : vector<8x128xf32>, vector<128x128xf32>, vector<8x128xf32> -> vector<8x128xf32>
    %c2_18 = arith.constant 2 : index
    %c0_19 = arith.constant 0 : index
    %c0_20 = arith.constant 0 : index
    %24 = vector.load %arg3[%c2_18, %c0_19, %c0_20] : memref<5x1x128xf32, #tpu.memory_space<vmem>>, vector<1x1x128xf32>
    %25 = vector.shape_cast %24 : vector<1x1x128xf32> to vector<1x128xf32>
    %26 = vector.broadcast %25 : vector<1x128xf32> to vector<8x128xf32>
    %27 = arith.addf %23, %26 : vector<8x128xf32>
    %cst_21 = arith.constant 0.00999999977 : f32
    %28 = vector.broadcast %cst_21 : f32 to vector<8x128xf32>
    %29 = arith.mulf %28, %27 : vector<8x128xf32>
    %30 = arith.maximumf %27, %29 : vector<8x128xf32>
    %c3 = arith.constant 3 : index
    %c0_22 = arith.constant 0 : index
    %c0_23 = arith.constant 0 : index
    %31 = vector.load %arg2[%c3, %c0_22, %c0_23] : memref<5x128x128xf32, #tpu.memory_space<vmem>>, vector<1x128x128xf32>
    %32 = vector.shape_cast %31 : vector<1x128x128xf32> to vector<128x128xf32>
    %cst_24 = arith.constant dense<0.000000e+00> : vector<8x128xf32>
    %33 = tpu.matmul %30, %32, %cst_24 {dimension_numbers = #tpu.dot_dimension_numbers<[1], [0], [0], [1], [0, 0, 1, 1], [], []>} : vector<8x128xf32>, vector<128x128xf32>, vector<8x128xf32> -> vector<8x128xf32>
    %c3_25 = arith.constant 3 : index
    %c0_26 = arith.constant 0 : index
    %c0_27 = arith.constant 0 : index
    %34 = vector.load %arg3[%c3_25, %c0_26, %c0_27] : memref<5x1x128xf32, #tpu.memory_space<vmem>>, vector<1x1x128xf32>
    %35 = vector.shape_cast %34 : vector<1x1x128xf32> to vector<1x128xf32>
    %36 = vector.broadcast %35 : vector<1x128xf32> to vector<8x128xf32>
    %37 = arith.addf %33, %36 : vector<8x128xf32>
    %cst_28 = arith.constant 0.00999999977 : f32
    %38 = vector.broadcast %cst_28 : f32 to vector<8x128xf32>
    %39 = arith.mulf %38, %37 : vector<8x128xf32>
    %40 = arith.maximumf %37, %39 : vector<8x128xf32>
    %c4 = arith.constant 4 : index
    %c0_29 = arith.constant 0 : index
    %c0_30 = arith.constant 0 : index
    %41 = vector.load %arg2[%c4, %c0_29, %c0_30] : memref<5x128x128xf32, #tpu.memory_space<vmem>>, vector<1x128x128xf32>
    %42 = vector.shape_cast %41 : vector<1x128x128xf32> to vector<128x128xf32>
    %cst_31 = arith.constant dense<0.000000e+00> : vector<8x128xf32>
    %43 = tpu.matmul %40, %42, %cst_31 {dimension_numbers = #tpu.dot_dimension_numbers<[1], [0], [0], [1], [0, 0, 1, 1], [], []>} : vector<8x128xf32>, vector<128x128xf32>, vector<8x128xf32> -> vector<8x128xf32>
    %c4_32 = arith.constant 4 : index
    %c0_33 = arith.constant 0 : index
    %c0_34 = arith.constant 0 : index
    %44 = vector.load %arg3[%c4_32, %c0_33, %c0_34] : memref<5x1x128xf32, #tpu.memory_space<vmem>>, vector<1x1x128xf32>
    %45 = vector.shape_cast %44 : vector<1x1x128xf32> to vector<1x128xf32>
    %46 = vector.broadcast %45 : vector<1x128xf32> to vector<8x128xf32>
    %47 = arith.addf %43, %46 : vector<8x128xf32>
    %48 = math.tanh %47 : vector<8x128xf32>
    %c0_35 = arith.constant 0 : index
    %c0_36 = arith.constant 0 : index
    %49 = vector.load %arg4[%c0_35, %c0_36] : memref<8x128xf32, #tpu.memory_space<vmem>>, vector<8x128xf32>
    tpu.vector_store %arg4[%c0_35, %c0_36], %48 {strides = array<i32>} : memref<8x128xf32, #tpu.memory_space<vmem>>, vector<8x128xf32>,
    return
  }
  func.func @transform_0(%arg0: i32) -> (i32, i32) {
    %c0_i32 = arith.constant 0 : i32
    %c0_i32_0 = arith.constant 0 : i32
    return %arg0, %c0_i32 : i32, i32
  }
  func.func @transform_1(%arg0: i32) -> (i32, i32, i32) {
    %c0_i32 = arith.constant 0 : i32
    %c0_i32_0 = arith.constant 0 : i32
    %c0_i32_1 = arith.constant 0 : i32
    %c0_i32_2 = arith.constant 0 : i32
    return %c0_i32, %c0_i32_0, %c0_i32_1 : i32, i32, i32
  }
  func.func @transform_2(%arg0: i32) -> (i32, i32, i32) {
    %c0_i32 = arith.constant 0 : i32
    %c0_i32_0 = arith.constant 0 : i32
    %c0_i32_1 = arith.constant 0 : i32
    %c0_i32_2 = arith.constant 0 : i32
    return %c0_i32, %c0_i32_0, %c0_i32_1 : i32, i32, i32
  }
  func.func @transform_3(%arg0: i32) -> (i32, i32) {
    %c0_i32 = arith.constant 0 : i32
    %c0_i32_0 = arith.constant 0 : i32
    return %arg0, %c0_i32 : i32, i32
  }
}

</mosaic_0001>

<bundles_post_ra>
// kernel: tpu_custom_call.1
= control target key start
LH: loop header
LB: loop body
LE: loop exit
PB: predicated region body
PF: predicated region fallthrough
CT: control target
= control target key end

     0   :  { %8 = vsyncpa [#allocation3], 0  ;;  %s1148_s0 = inlined_call_operand.hbm [shape: f32[8,128], index: 0, kind: input, shape index: {}]   ;;  %s1149_s1 = inlined_call_operand.hbm [shape: f32[5,128,128], index: 1, kind: input, shape index: {}]   ;;  %s1150_s2 = inlined_call_operand.vmem [shape: f32[5,1,128], index: 2, kind: input, shape index: {}]   ;;  %s1151_s3 = inlined_call_operand.hbm [shape: f32[8,128], index: 3, kind: output, shape index: {}]  }
   0x1   :  { %9 = vsyncpa [#allocation6], 0 }
   0x2   :  { %10 = vsyncpa [#allocation4], 0  ;;  %s1012_s12 = smov [#allocation2]   ;;  %s1013_s14 = smov [#allocation5]  }
   0x3   :  { %s17_s13 = sshll.u32 %s1012_s12, 4  ;;  %s26_s15 = sshll.u32 %s1013_s14, 4  ;;  %s18_s13 = int_to_ptr.vmem [resolvable:$true] %s17_s13  ;;  %s1040_s15 = int_to_ptr.vmem [resolvable:$true] %s26_s15 }
   0x4   :  { %s940_s18 = scalar_lea.hbm %s1148_s0, 128 }
   0x5   :  { %p941_p0 = scmp.ne.s32.totalorder %s1148_s0, %s940_s18  ;;  %p944_p1 = scmp.lt.u32.totalorder %s940_s18, %s1148_s0 }
   0x7   :  { %p946_p2 = pnand %p944_p1, %p941_p0 }
   0x9   :  { %949 = shalt.err (!%p946_p2)
}
   0xa   :  { %s950_s23 = scalar_lea.vmem %s18_s13, 128  ;;  %p955_p4 = scmp.lt.s32.totalorder %s18_s13, %s18_s13 }
   0xb   :  { %p951_p3 = scmp.ne.s32.totalorder %s18_s13, %s950_s23  ;;  %p956_p5 = scmp.lt.s32.totalorder %s950_s23, %s950_s23 }
   0xd   :  { %p957_p6 = por %p956_p5, %p955_p4 }
   0xf   :  { %p958_p7 = pnand %p957_p6, %p951_p3 }
  0x11   :  { %961 = shalt.err (!%p958_p7)
}
  0x12   :  { %20 = dma.hbm_to_vmem [thread:$0]  %s1148_s0, 128, %s18_s13, [#allocation3]  }
  0x13   :  { %s962_s28 = scalar_lea.hbm %s1149_s1, 10240 }
  0x14   :  { %p963_p8 = scmp.ne.s32.totalorder %s1149_s1, %s962_s28  ;;  %p966_p9 = scmp.lt.u32.totalorder %s962_s28, %s1149_s1 }
  0x16   :  { %p968_p10 = pnand %p966_p9, %p963_p8 }
  0x18   :  { %971 = shalt.err (!%p968_p10)
}
  0x19   :  { %s972_s6 = scalar_lea.vmem %s1040_s15, 10240  ;;  %p977_p12 = scmp.lt.s32.totalorder %s1040_s15, %s1040_s15 }
  0x1a   :  { %p973_p11 = scmp.ne.s32.totalorder %s1040_s15, %s972_s6  ;;  %p978_p13 = scmp.lt.s32.totalorder %s972_s6, %s972_s6 }
  0x1c   :  { %p979_p0 = por %p978_p13, %p977_p12 }
  0x1e   :  { %p980_p1 = pnand %p979_p0, %p973_p11 }
  0x20   :  { %983 = shalt.err (!%p980_p1)
}
  0x21   :  { %s1014_s0 = smov 128   ;;  %s1015_s7 = smov 8  }
  0x22   :  { %32 = dma.hbm_to_vmem [thread:$0]  %s1149_s1, 10240, %s1040_s15, [#allocation6], %s1014_s0, %s1014_s0, %s1015_s7  }
  0x23   :  { %1006 = dma.done.wait [#allocation3], 128  }
  0x24   :  { %1007 = vsyncadd [#allocation3], 4294967168 }
  0x25   :  { %1008 = dma.done.wait [#allocation6], 10240  }
  0x26   :  { %1009 = vsyncadd [#allocation6], 4294957056  ;;  %v1016_v0 = vmov 0.0|0.0   ;;  %vm1017_vm0 = vmmov 0   ;;  %v1018_v1 = vmov 0.0   ;;  %v42_v2 = vld [vmem:[#allocation5] sm:$0xff] }
  0x27   :  { %810 = vmatprep.subr.bf16.mxu0 %v1016_v0  ;;  %667 = vmatprep.mubr.msk.f32.mxu0 %vm1017_vm0, %v1018_v1  ;;  %v43_v3 = vld [vmem:[#allocation5 + $0x8] sm:$0xff]  ;;  %v44_v4 = vld [vmem:[#allocation5 + $0x10] sm:$0xff]  ;;  %v45_v6 = vld [vmem:[#allocation5 + $0x18] sm:$0xff]  ;;  %s1019_s19 = smov [#allocation7]  }
  0x28   :  { %834 = vmatprep.subr.bf16.mxu1 %v1016_v0  ;;  %702 = vmatprep.mubr.msk.f32.mxu1 %vm1017_vm0, %v1018_v1  ;;  %v811_v5 = vpack.c.bf16 %v43_v3, %v42_v2  ;;  %v814_v7 = vpack.c.bf16 %v45_v6, %v44_v4  ;;  %v46_v8 = vld [vmem:[#allocation5 + $0x20] sm:$0xff]  ;;  %v47_v9 = vld [vmem:[#allocation5 + $0x28] sm:$0xff]  ;;  %v140_v12 = vld [vmem:[#allocation5 + $0x90] sm:$0xff]  ;;  %s531_s20 = sshll.u32 %s1019_s19, 4  ;;  %s532_s20 = int_to_ptr.vmem [resolvable:$true] %s531_s20 }
  0x29   :  { %v138_v10 = vld [vmem:[#allocation5 + $0x80] sm:$0xff]  ;;  %v139_v11 = vld [vmem:[#allocation5 + $0x88] sm:$0xff]  ;;  %v141_v13 = vld [vmem:[#allocation5 + $0x98] sm:$0xff]  ;;  %v817_v14 = vpack.c.bf16 %v47_v9, %v46_v8  ;;  %s984_s21 = scalar_lea.vmem %s532_s20, 128  ;;  %p989_p3 = scmp.lt.s32.totalorder %s532_s20, %s532_s20 }
  0x2a   :  { %812 = vmatpush3.bf16.msra.mxu0 %v811_v5  ;;  %v835_v15 = vpack.c.bf16 %v139_v11, %v138_v10  ;;  %v48_v16 = vld [vmem:[#allocation5 + $0x30] sm:$0xff]  ;;  %v49_v17 = vld [vmem:[#allocation5 + $0x38] sm:$0xff]  ;;  %v838_v18 = vpack.c.bf16 %v141_v13, %v140_v12  ;;  %v142_v19 = vld [vmem:[#allocation5 + $0xa0] sm:$0xff]  ;;  %p985_p2 = scmp.ne.s32.totalorder %s532_s20, %s984_s21  ;;  %p990_p4 = scmp.lt.s32.totalorder %s984_s21, %s984_s21 }
  0x2b   :  { %813 = vmatprep.subr.bf16.mxu0 %v1016_v0  ;;  %v143_v20 = vld [vmem:[#allocation5 + $0xa8] sm:$0xff]  ;;  %v820_v21 = vpack.c.bf16 %v49_v17, %v48_v16  ;;  %v50_v22 = vld [vmem:[#allocation5 + $0x40] sm:$0xff]  ;;  %v144_v25 = vld [vmem:[#allocation5 + $0xb0] sm:$0xff] }
  0x2c   :  { %836 = vmatpush3.bf16.msra.mxu1 %v835_v15  ;;  %v51_v23 = vld [vmem:[#allocation5 + $0x48] sm:$0xff]  ;;  %v841_v24 = vpack.c.bf16 %v143_v20, %v142_v19  ;;  %v145_v26 = vld [vmem:[#allocation5 + $0xb8] sm:$0xff]  ;;  %v52_v28 = vld [vmem:[#allocation5 + $0x50] sm:$0xff]  ;;  %p991_p5 = por %p990_p4, %p989_p3 }
  0x2d   :  { %837 = vmatprep.subr.bf16.mxu1 %v1016_v0  ;;  %v823_v27 = vpack.c.bf16 %v51_v23, %v50_v22  ;;  %v53_v29 = vld [vmem:[#allocation5 + $0x58] sm:$0xff]  ;;  %v844_v30 = vpack.c.bf16 %v145_v26, %v144_v25  ;;  %v146_v31 = vld [vmem:[#allocation5 + $0xc0] sm:$0xff]  ;;  %v147_v32 = vld [vmem:[#allocation5 + $0xc8] sm:$0xff] }
  0x2e   :  { %815 = vmatpush3.bf16.msra.mxu0 %v814_v7  ;;  %v826_v33 = vpack.c.bf16 %v53_v29, %v52_v28  ;;  %v54_v34 = vld [vmem:[#allocation5 + $0x60] sm:$0xff]  ;;  %v55_v35 = vld [vmem:[#allocation5 + $0x68] sm:$0xff]  ;;  %v847_v36 = vpack.c.bf16 %v147_v32, %v146_v31  ;;  %v148_v37 = vld [vmem:[#allocation5 + $0xd0] sm:$0xff]  ;;  %p992_p6 = pnand %p991_p5, %p985_p2 }
  0x2f   :  { %816 = vmatprep.subr.bf16.mxu0 %v1016_v0  ;;  %v149_v38 = vld [vmem:[#allocation5 + $0xd8] sm:$0xff]  ;;  %v829_v39 = vpack.c.bf16 %v55_v35, %v54_v34  ;;  %v56_v40 = vld [vmem:[#allocation5 + $0x70] sm:$0xff]  ;;  %v150_v45 = vld [vmem:[#allocation5 + $0xe0] sm:$0xff] }
  0x30   :  { %839 = vmatpush3.bf16.msra.mxu1 %v838_v18  ;;  %v57_v41 = vld [vmem:[#allocation5 + $0x78] sm:$0xff]  ;;  %v850_v42 = vpack.c.bf16 %v149_v38, %v148_v37  ;;  %v151_v46 = vld [vmem:[#allocation5 + $0xe8] sm:$0xff]  ;;  %v152_v48 = vld [vmem:[#allocation5 + $0xf0] sm:$0xff] }
  0x31   :  { %840 = vmatprep.subr.bf16.mxu1 %v1016_v0  ;;  %v832_v43 = vpack.c.bf16 %v57_v41, %v56_v40  ;;  %v41_v44 = vld [vmem:[#allocation2] sm:$0xff]  ;;  %v853_v47 = vpack.c.bf16 %v151_v46, %v150_v45  ;;  %v235_v51 = vld [vmem:[#allocation5 + $0x100] sm:$0xff]  ;;  %v236_v52 = vld [vmem:[#allocation5 + $0x108] sm:$0xff] }
  0x32   :  { %818 = vmatpush3.bf16.msra.mxu0 %v817_v14  ;;  %v153_v49 = vld [vmem:[#allocation5 + $0xf8] sm:$0xff]  ;;  %v237_v53 = vld [vmem:[#allocation5 + $0x110] sm:$0xff]  ;;  %v859_v54 = vpack.c.bf16 %v236_v52, %v235_v51  ;;  %v239_v57 = vld [vmem:[#allocation5 + $0x120] sm:$0xff] }
  0x33   :  { %819 = vmatprep.subr.bf16.mxu0 %v1016_v0  ;;  %v856_v50 = vpack.c.bf16 %v153_v49, %v152_v48  ;;  %v238_v55 = vld [vmem:[#allocation5 + $0x118] sm:$0xff]  ;;  %v240_v58 = vld [vmem:[#allocation5 + $0x128] sm:$0xff]  ;;  %v241_v60 = vld [vmem:[#allocation5 + $0x130] sm:$0xff] }
  0x34   :  { %842 = vmatpush3.bf16.msra.mxu1 %v841_v24  ;;  %v862_v56 = vpack.c.bf16 %v238_v55, %v237_v53  ;;  %v865_v59 = vpack.c.bf16 %v240_v58, %v239_v57  ;;  %v242_v61 = vld [vmem:[#allocation5 + $0x138] sm:$0xff]  ;;  %v243_v63 = vld [vmem:[#allocation5 + $0x140] sm:$0xff]  ;;  %v244_v2 = vld [vmem:[#allocation5 + $0x148] sm:$0xff] }
  0x35   :  { %843 = vmatprep.subr.bf16.mxu1 %v1016_v0  ;;  %v868_v62 = vpack.c.bf16 %v242_v61, %v241_v60  ;;  %v871_v3 = vpack.c.bf16 %v244_v2, %v243_v63  ;;  %v245_v4 = vld [vmem:[#allocation5 + $0x150] sm:$0xff]  ;;  %v246_v5 = vld [vmem:[#allocation5 + $0x158] sm:$0xff]  ;;  %v247_v13 = vld [vmem:[#allocation5 + $0x160] sm:$0xff] }
  0x36   :  { %821 = vmatpush3.bf16.msra.mxu0 %v820_v21  ;;  %v874_v6 = vpack.c.bf16 %v246_v5, %v245_v4  ;;  %v541_v7 = vld [vmem:[%s1150_s2] ss:$0 sm:$0xff]  ;;  %v248_v14 = vld [vmem:[#allocation5 + $0x168] sm:$0xff]  ;;  %v249_v16 = vld [vmem:[#allocation5 + $0x170] sm:$0xff] }
  0x37   :  { %822 = vmatprep.subr.bf16.mxu0 %v1016_v0  ;;  %v877_v15 = vpack.c.bf16 %v248_v14, %v247_v13  ;;  %v250_v17 = vld [vmem:[#allocation5 + $0x178] sm:$0xff]  ;;  %v332_v19 = vld [vmem:[#allocation5 + $0x180] sm:$0xff]  ;;  %v333_v20 = vld [vmem:[#allocation5 + $0x188] sm:$0xff] }
  0x38   :  { %845 = vmatpush3.bf16.msra.mxu1 %v844_v30  ;;  %v880_v18 = vpack.c.bf16 %v250_v17, %v249_v16  ;;  %v334_v21 = vld [vmem:[#allocation5 + $0x190] sm:$0xff]  ;;  %v883_v22 = vpack.c.bf16 %v333_v20, %v332_v19  ;;  %v335_v23 = vld [vmem:[#allocation5 + $0x198] sm:$0xff]  ;;  %v336_v25 = vld [vmem:[#allocation5 + $0x1a0] sm:$0xff] }
  0x39   :  { %846 = vmatprep.subr.bf16.mxu1 %v1016_v0  ;;  %v886_v24 = vpack.c.bf16 %v335_v23, %v334_v21  ;;  %v337_v26 = vld [vmem:[#allocation5 + $0x1a8] sm:$0xff]  ;;  %v338_v28 = vld [vmem:[#allocation5 + $0x1b0] sm:$0xff]  ;;  %v339_v29 = vld [vmem:[#allocation5 + $0x1b8] sm:$0xff] }
  0x3a   :  { %824 = vmatpush3.bf16.msra.mxu0 %v823_v27  ;;  %v889_v27 = vpack.c.bf16 %v337_v26, %v336_v25  ;;  %v892_v30 = vpack.c.bf16 %v339_v29, %v338_v28  ;;  %v340_v31 = vld [vmem:[#allocation5 + $0x1c0] sm:$0xff]  ;;  %v341_v32 = vld [vmem:[#allocation5 + $0x1c8] sm:$0xff]  ;;  %v342_v34 = vld [vmem:[#allocation5 + $0x1d0] sm:$0xff] }
  0x3b   :  { %825 = vmatprep.subr.bf16.mxu0 %v1016_v0  ;;  %v343_v35 = vld [vmem:[#allocation5 + $0x1d8] sm:$0xff]  ;;  %v346_v46 = vld [vmem:[#allocation5 + $0x1f0] sm:$0xff]  ;;  %v429_v49 = vld [vmem:[#allocation5 + $0x200] sm:$0xff] }
  0x3c   :  { %848 = vmatpush3.bf16.msra.mxu1 %v847_v36  ;;  %v898_v36 = vpack.c.bf16 %v343_v35, %v342_v34  ;;  %v543_v37 = vld [vmem:[%s1150_s2 + $0x1] ss:$0 sm:$0xff]  ;;  %v431_v51 = vld [vmem:[#allocation5 + $0x210] sm:$0xff]  ;;  %v434_v55 = vld [vmem:[#allocation5 + $0x228] sm:$0xff] }
  0x3d   :  { %849 = vmatprep.subr.bf16.mxu1 %v1016_v0  ;;  %v432_v53 = vld [vmem:[#allocation5 + $0x218] sm:$0xff]  ;;  %v435_v57 = vld [vmem:[#allocation5 + $0x230] sm:$0xff]  ;;  %v437_v60 = vld [vmem:[#allocation5 + $0x240] sm:$0xff] }
  0x3e   :  { %827 = vmatpush3.bf16.msra.mxu0 %v826_v33  ;;  %v895_v33 = vpack.c.bf16 %v341_v32, %v340_v31  ;;  %v436_v58 = vld [vmem:[#allocation5 + $0x238] sm:$0xff]  ;;  %v438_v61 = vld [vmem:[#allocation5 + $0x248] sm:$0xff]  ;;  %v439_v63 = vld [vmem:[#allocation5 + $0x250] sm:$0xff] }
  0x3f   :  { %828 = vmatprep.subr.bf16.mxu0 %v1016_v0  ;;  %v440_v2 = vld [vmem:[#allocation5 + $0x258] sm:$0xff]  ;;  %v443_v13 = vld [vmem:[#allocation5 + $0x270] sm:$0xff] }
  0x40   :  { %851 = vmatpush3.bf16.msra.mxu1 %v850_v42  ;;  %v545_v4 = vld [vmem:[%s1150_s2 + $0x2] ss:$0 sm:$0xff]  ;;  %v547_v16 = vld [vmem:[%s1150_s2 + $0x3] ss:$0 sm:$0xff] }
  0x41   :  { %852 = vmatprep.subr.bf16.mxu1 %v1016_v0  ;;  %v444_v14 = vld [vmem:[#allocation5 + $0x278] sm:$0xff] }
  0x42   :  { %830 = vmatpush3.bf16.msra.mxu0 %v829_v39 }
  0x43   :  { %831 = vmatprep.subr.bf16.mxu0 %v1016_v0 }
  0x44   :  { %854 = vmatpush3.bf16.msra.mxu1 %v853_v47  ;;  %v347_v47 = vld [vmem:[#allocation5 + $0x1f8] sm:$0xff] }
  0x45   :  { %855 = vmatprep.subr.bf16.mxu1 %v1016_v0  ;;  %v904_v48 = vpack.c.bf16 %v347_v47, %v346_v46 }
  0x46   :  { %833 = vmatpush3.bf16.msra.mxu0 %v832_v43  ;;  %v344_v43 = vld [vmem:[#allocation5 + $0x1e0] sm:$0xff] }
  0x47   :  { %858 = vmatprep.subr.bf16.mxu0 %v1016_v0 }
  0x48   :  { %857 = vmatpush3.bf16.msra.mxu1 %v856_v50  ;;  %v430_v50 = vld [vmem:[#allocation5 + $0x208] sm:$0xff] }
  0x49   :  { %668 = vmatmul.mubr.f32.vlgmr.msra.gmra.mrb[0].mxu0 %v41_v44  ;;  %882 = vmatprep.subr.bf16.mxu1 %v1016_v0  ;;  %v345_v44 = vld [vmem:[#allocation5 + $0x1e8] sm:$0xff]  ;;  %v907_v52 = vpack.c.bf16 %v430_v50, %v429_v49 }
  0x4a   :  { %737 = vmatprep.mubr.msk.f32.mxu0 %vm1017_vm0, %v1018_v1  ;;  %860 = vmatpush3.bf16.msra.mxu0 %v859_v54  ;;  %v901_v45 = vpack.c.bf16 %v345_v44, %v344_v43  ;;  %v910_v54 = vpack.c.bf16 %v432_v53, %v431_v51 }
  0x4b   :  { %861 = vmatprep.subr.bf16.mxu0 %v1016_v0 }
  0x4e   :  { %863 = vmatpush3.bf16.msra.mxu0 %v862_v56 }
  0x4f   :  { %864 = vmatprep.subr.bf16.mxu0 %v1016_v0 }
  0x52   :  { %866 = vmatpush3.bf16.msra.mxu0 %v865_v59  ;;  %v916_v59 = vpack.c.bf16 %v436_v58, %v435_v57 }
  0x53   :  { %867 = vmatprep.subr.bf16.mxu0 %v1016_v0 }
  0x56   :  { %869 = vmatpush3.bf16.msra.mxu0 %v868_v62  ;;  %v919_v62 = vpack.c.bf16 %v438_v61, %v437_v60 }
  0x57   :  { %870 = vmatprep.subr.bf16.mxu0 %v1016_v0 }
  0x5a   :  { %872 = vmatpush3.bf16.msra.mxu0 %v871_v3  ;;  %v922_v3 = vpack.c.bf16 %v440_v2, %v439_v63 }
  0x5b   :  { %873 = vmatprep.subr.bf16.mxu0 %v1016_v0 }
  0x5e   :  { %875 = vmatpush3.bf16.msra.mxu0 %v874_v6 }
  0x5f   :  { %876 = vmatprep.subr.bf16.mxu0 %v1016_v0 }
  0x62   :  { %878 = vmatpush3.bf16.msra.mxu0 %v877_v15  ;;  %v928_v15 = vpack.c.bf16 %v444_v14, %v443_v13 }
  0x63   :  { %879 = vmatprep.subr.bf16.mxu0 %v1016_v0 }
  0x66   :  { %881 = vmatpush3.bf16.msra.mxu0 %v880_v18 }
  0x67   :  { %906 = vmatprep.subr.bf16.mxu0 %v1016_v0 }
 0x11c   :  { %v131_v8 = vpop.f32.mrb[0].mxu0 }
 0x11d   :  { %v132_v9 = vadd.f32 %v541_v7, %v131_v8  ;;  %v669_v10 = vpop.f32.mrb[1].mxu0 }
 0x11e   :  { %v441_v10 = vld [vmem:[#allocation5 + $0x260] sm:$0xff] }
 0x11f   :  { %v135_v11 = vmul.f32 0.01, %v132_v9 }
 0x121   :  { %v136_v12 = vmax.f32 %v132_v9, %v135_v11  ;;  %v442_v11 = vld [vmem:[#allocation5 + $0x268] sm:$0xff] }
 0x123   :  { %703 = vmatmul.mubr.f32.vlgmr.msra.gmra.mrb[0].mxu1 %v136_v12  ;;  %v925_v12 = vpack.c.bf16 %v442_v11, %v441_v10 }
 0x124   :  { %772 = vmatprep.mubr.msk.f32.mxu1 %vm1017_vm0, %v1018_v1  ;;  %884 = vmatpush3.bf16.msra.mxu1 %v883_v22  ;;  %v549_v22 = vld [vmem:[%s1150_s2 + $0x4] ss:$0 sm:$0xff] }
 0x125   :  { %885 = vmatprep.subr.bf16.mxu1 %v1016_v0 }
 0x128   :  { %887 = vmatpush3.bf16.msra.mxu1 %v886_v24 }
 0x129   :  { %888 = vmatprep.subr.bf16.mxu1 %v1016_v0 }
 0x12c   :  { %890 = vmatpush3.bf16.msra.mxu1 %v889_v27 }
 0x12d   :  { %891 = vmatprep.subr.bf16.mxu1 %v1016_v0 }
 0x130   :  { %893 = vmatpush3.bf16.msra.mxu1 %v892_v30 }
 0x131   :  { %894 = vmatprep.subr.bf16.mxu1 %v1016_v0 }
 0x134   :  { %896 = vmatpush3.bf16.msra.mxu1 %v895_v33 }
 0x135   :  { %897 = vmatprep.subr.bf16.mxu1 %v1016_v0 }
 0x138   :  { %899 = vmatpush3.bf16.msra.mxu1 %v898_v36 }
 0x139   :  { %900 = vmatprep.subr.bf16.mxu1 %v1016_v0 }
 0x13c   :  { %902 = vmatpush3.bf16.msra.mxu1 %v901_v45 }
 0x13d   :  { %903 = vmatprep.subr.bf16.mxu1 %v1016_v0 }
 0x140   :  { %905 = vmatpush3.bf16.msra.mxu1 %v904_v48 }
 0x1f6   :  { %v228_v38 = vpop.f32.mrb[0].mxu1 }
 0x1f7   :  { %v229_v39 = vadd.f32 %v543_v37, %v228_v38  ;;  %v704_v40 = vpop.f32.mrb[1].mxu1 }
 0x1f9   :  { %v232_v41 = vmul.f32 0.01, %v229_v39 }
 0x1fb   :  { %v233_v42 = vmax.f32 %v229_v39, %v232_v41 }
 0x1fd   :  { %738 = vmatmul.mubr.f32.vlgmr.msra.gmra.mrb[2].mxu0 %v233_v42 }
 0x1fe   :  { %807 = vmatprep.mubr.msk.f32.mxu0 %vm1017_vm0, %v1018_v1  ;;  %908 = vmatpush3.bf16.msra.mxu0 %v907_v52  ;;  %v433_v1 = vld [vmem:[#allocation5 + $0x220] sm:$0xff] }
 0x1ff   :  { %909 = vmatprep.subr.bf16.mxu0 %v1016_v0  ;;  %v913_v56 = vpack.c.bf16 %v434_v55, %v433_v1 }
 0x202   :  { %911 = vmatpush3.bf16.msra.mxu0 %v910_v54 }
 0x203   :  { %912 = vmatprep.subr.bf16.mxu0 %v1016_v0 }
 0x206   :  { %914 = vmatpush3.bf16.msra.mxu0 %v913_v56 }
 0x207   :  { %915 = vmatprep.subr.bf16.mxu0 %v1016_v0 }
 0x20a   :  { %917 = vmatpush3.bf16.msra.mxu0 %v916_v59 }
 0x20b   :  { %918 = vmatprep.subr.bf16.mxu0 %v1016_v0 }
 0x20e   :  { %920 = vmatpush3.bf16.msra.mxu0 %v919_v62 }
 0x20f   :  { %921 = vmatprep.subr.bf16.mxu0 %v1016_v0 }
 0x212   :  { %923 = vmatpush3.bf16.msra.mxu0 %v922_v3 }
 0x213   :  { %924 = vmatprep.subr.bf16.mxu0 %v1016_v0 }
 0x216   :  { %926 = vmatpush3.bf16.msra.mxu0 %v925_v12 }
 0x217   :  { %927 = vmatprep.subr.bf16.mxu0 %v1016_v0 }
 0x21a   :  { %929 = vmatpush3.bf16.msra.mxu0 %v928_v15 }
 0x2d0   :  { %v325_v5 = vpop.f32.mrb[2].mxu0 }
 0x2d1   :  { %v326_v6 = vadd.f32 %v545_v4, %v325_v5  ;;  %v739_v7 = vpop.f32.mrb[3].mxu0 }
 0x2d3   :  { %v329_v8 = vmul.f32 0.01, %v326_v6 }
 0x2d5   :  { %v330_v9 = vmax.f32 %v326_v6, %v329_v8 }
 0x2d7   :  { %773 = vmatmul.mubr.f32.vlgmr.msra.gmra.mrb[2].mxu1 %v330_v9 }
 0x3aa   :  { %v422_v17 = vpop.f32.mrb[2].mxu1 }
 0x3ab   :  { %v423_v18 = vadd.f32 %v547_v16, %v422_v17  ;;  %v774_v19 = vpop.f32.mrb[3].mxu1 }
 0x3ad   :  { %v426_v20 = vmul.f32 0.01, %v423_v18 }
 0x3af   :  { %v427_v21 = vmax.f32 %v423_v18, %v426_v20 }
 0x3b1   :  { %808 = vmatmul.mubr.f32.vlgmr.msra.gmra.mrb[4].mxu0 %v427_v21 }
 0x484   :  { %v519_v23 = vpop.f32.mrb[4].mxu0 }
 0x485   :  { %v520_v0 = vadd.f32 %v549_v22, %v519_v23  ;;  %v809_v24 = vpop.f32.mrb[5].mxu0 }
 0x487   :  { %938 = vtanh.f32 %v520_v0 }
 0x491   :  { %v939_v25 = vpop.eup %938 }
 0x492   :  { %524 = vst [vmem:[#allocation7] sm:$0xff] %v939_v25 }
 0x493   :  { %995 = shalt.err (!%p992_p6)
}
 0x494   :  { %s996_s2 = scalar_lea.hbm %s1151_s3, 128 }
 0x495   :  { %p997_p7 = scmp.ne.s32.totalorder %s1151_s3, %s996_s2  ;;  %p1000_p8 = scmp.lt.u32.totalorder %s996_s2, %s1151_s3 }
 0x497   :  { %p1002_p9 = pnand %p1000_p8, %p997_p7 }
 0x499   :  { %1005 = shalt.err (!%p1002_p9)
}
 0x49a   :  { %534 = dma.vmem_to_hbm [thread:$0]  %s532_s20, 128, %s1151_s3, [#allocation4]  }
 0x49b   :  { %1010 = dma.done.wait [#allocation4], 128  }
 0x49c   :  { %1011 = vsyncadd [#allocation4], 4294967168 }
 0x49d   :  { %538 = vsyncpa [#allocation3], 1 }
 0x49e   :  { %539 = vsyncpa [#allocation6], 1 }
 0x49f   :  { %540 = vsyncpa [#allocation4], 1 }

</bundles_post_ra>
